<compile_context>
chip_gen: v5e
topology: v5e:2x2
jax: 0.10.0
libtpu: 0.0.40
codegen_flags: <defaults>
</compile_context>

<pallas_src>
import functools

import jax
import jax.numpy as jnp
from jax import lax
from jax.experimental import pallas as pl
from jax.experimental.pallas import tpu as pltpu


def _smooth_ce_kernel(logits_ref, labels_ref, loss_ref, *, alpha: float,
                      n_total: int):
    x = logits_ref[...].astype(jnp.float32)                   # (TN, C)
    tn, c = x.shape

    # Numerically-stable per-row log-sum-exp (the only EUP/XLU work needed).
    m = jnp.max(x, axis=-1, keepdims=True)                    # (TN, 1)
    shifted = x - m                                            # (TN, C)
    lse = jnp.log(jnp.sum(jnp.exp(shifted), axis=-1, keepdims=True))  # (TN, 1)

    # shifted logit at the label, extracted via iota compare (no dense one-hot
    # target materialized, no (TN, C) log_probs tensor ever built).
    labels = labels_ref[...]                                   # (TN, 1) int32
    col = lax.broadcasted_iota(jnp.int32, (tn, c), 1)
    x_at_label = jnp.sum(jnp.where(col == labels, shifted, 0.0),
                         axis=-1, keepdims=True)               # (TN, 1)

    # loss_i = (1-a)*(lse - shifted[y]) + (a/C)*(C*lse - sum_j shifted)
    per_row = (1.0 - alpha) * (lse - x_at_label)               # (TN, 1)
    if alpha != 0.0:
        sum_shifted = jnp.sum(shifted, axis=-1, keepdims=True)  # (TN, 1)
        per_row = per_row + (alpha / c) * (c * lse - sum_shifted)

    # Zero contribution of rows that only exist because of batch padding.
    row_ids = pl.program_id(0) * tn + lax.broadcasted_iota(jnp.int32, (tn, 1), 0)
    loss_ref[...] = jnp.where(row_ids < n_total, per_row, 0.0)


def smooth_cross_entropy(logits: jax.Array, labels: jax.Array,
                         alpha: float = 0.1,
                         block_rows: int | None = None) -> jax.Array:
    """Pallas TPU implementation of SmoothCrossEntropy.forward (mean loss)."""
    n, c = logits.shape
    labels2d = labels.reshape(n, 1).astype(jnp.int32)
    itemsize = jnp.dtype(logits.dtype).itemsize

    if block_rows is None:
        # ~4 MiB per logits block; with double buffering plus in-kernel f32
        # temporaries this stays well under the scoped-VMEM default on
        # v5e/v6e (32/128 MiB) and v7x (32/64 MiB), while being large enough
        # (>=512 rows for small C) to sit near the HBM roofline.
        rows = (4 * 1024 * 1024) // max(c * itemsize, 1)
        rows = max(8, min(1024, rows))
        rows = min(rows, ((n + 7) // 8) * 8)       # don't exceed (padded) batch
        block_rows = max(8, (rows // 8) * 8)        # multiple of 8 sublanes

    n_pad = pl.cdiv(n, block_rows) * block_rows
    if n_pad != n:
        logits = jnp.pad(logits, ((0, n_pad - n), (0, 0)))
        labels2d = jnp.pad(labels2d, ((0, n_pad - n), (0, 0)))

    grid = (n_pad // block_rows,)
    cost = pl.CostEstimate(
        flops=6 * n * c,
        transcendentals=n * c + n,                  # exp per element + log per row
        bytes_accessed=n * c * itemsize + n * 4 + n_pad * 4,
    )

    per_row = pl.pallas_call(
        functools.partial(_smooth_ce_kernel, alpha=float(alpha), n_total=n),
        out_shape=jax.ShapeDtypeStruct((n_pad, 1), jnp.float32),
        grid=grid,
        in_specs=[
            pl.BlockSpec((block_rows, c), lambda i: (i, 0)),
            pl.BlockSpec((block_rows, 1), lambda i: (i, 0)),
        ],
        out_specs=pl.BlockSpec((block_rows, 1), lambda i: (i, 0)),
        compiler_params=pltpu.CompilerParams(
            dimension_semantics=("parallel",)),
        cost_estimate=cost,
    )(logits, labels2d)

    # Tiny final reduction over N scalars in plain JAX; uses the *global* N.
    return jnp.sum(per_row) / jnp.float32(n)


def _reference(logits, labels, alpha):
    # Plain-JAX reference mirroring the PyTorch module.
    c = logits.shape[-1]
    logp = jax.nn.log_softmax(logits.astype(jnp.float32), axis=-1)
    one_hot = jax.nn.one_hot(labels, c, dtype=jnp.float32)
    target = one_hot * (1.0 - alpha) + alpha / c
    return jnp.mean(-jnp.sum(target * logp, axis=-1))


if __name__ == "__main__":
    key = jax.random.PRNGKey(0)
    k_logits, k_labels = jax.random.split(key)

    # Small shapes consistent with the module: (batch, num_classes).
    N, C = 16, 32
    logits = jax.random.normal(k_logits, (N, C), dtype=jnp.float32)
    labels = jax.random.randint(k_labels, (N,), 0, C, dtype=jnp.int32)

    alpha = 0.1
    loss = smooth_cross_entropy(logits, labels, alpha=alpha)
    loss = jax.block_until_ready(loss)
    ref = _reference(logits, labels, alpha)
    assert jnp.allclose(loss, ref, rtol=1e-5, atol=1e-5), (loss, ref)

    # Exercise the batch-padding path and the alpha == 0 (plain CE) branch.
    N2 = 13
    logits2 = jax.random.normal(k_logits, (N2, C), dtype=jnp.float32)
    labels2 = jax.random.randint(k_labels, (N2,), 0, C, dtype=jnp.int32)
    loss2 = jax.block_until_ready(smooth_cross_entropy(logits2, labels2, alpha=0.0))
    ref2 = _reference(logits2, labels2, 0.0)
    assert jnp.allclose(loss2, ref2, rtol=1e-5, atol=1e-5), (loss2, ref2)

    print("KERNEL_OK")
</pallas_src>

<mosaic_0001>
module attributes {stable_mosaic.version = 11 : i64} {
  func.func @_smooth_ce_kernel(%arg0: i32, %arg1: memref<16x32xf32, #tpu.memory_space<vmem>>, %arg2: memref<16x1xi32, #tpu.memory_space<vmem>>, %arg3: memref<16x1xf32, #tpu.memory_space<vmem>>) attributes {dimension_semantics = [#tpu.dimension_semantics<parallel>], iteration_bounds = array<i64: 1>, scalar_prefetch = 0 : i64, scratch_operands = 0 : i64, tpu.core_type = #tpu.core_type<tc>, window_params = [{transform_indices = @transform_0, window_bounds = array<i64: 16, 32>}, {transform_indices = @transform_1, window_bounds = array<i64: 16, 1>}, {transform_indices = @transform_2, window_bounds = array<i64: 16, 1>}]} {
    %c0 = arith.constant 0 : index
    %c0_0 = arith.constant 0 : index
    %0 = vector.load %arg1[%c0, %c0_0] : memref<16x32xf32, #tpu.memory_space<vmem>>, vector<16x32xf32>
    %cst = arith.constant dense<0xFF800000> : vector<16xf32>
    %1 = vector.multi_reduction <maximumf>, %0, %cst [1] : vector<16x32xf32> to vector<16xf32>
    %2 = vector.shape_cast %1 : vector<16xf32> to vector<16x1xf32>
    %3 = vector.broadcast %2 : vector<16x1xf32> to vector<16x32xf32>
    %4 = arith.subf %0, %3 : vector<16x32xf32>
    %5 = math.exp %4 : vector<16x32xf32>
    %cst_1 = arith.constant dense<0.000000e+00> : vector<16xf32>
    %6 = vector.multi_reduction <add>, %5, %cst_1 [1] : vector<16x32xf32> to vector<16xf32>
    %7 = vector.shape_cast %6 : vector<16xf32> to vector<16x1xf32>
    %8 = math.log %7 : vector<16x1xf32>
    %c0_2 = arith.constant 0 : index
    %c0_3 = arith.constant 0 : index
    %9 = vector.load %arg2[%c0_2, %c0_3] : memref<16x1xi32, #tpu.memory_space<vmem>>, vector<16x1xi32>
    %10 = tpu.iota {dimensions = array<i32: 1>} : vector<16x32xi32>
    %11 = vector.broadcast %9 : vector<16x1xi32> to vector<16x32xi32>
    %12 = arith.cmpi eq, %10, %11 : vector<16x32xi32>
    %cst_4 = arith.constant 0.000000e+00 : f32
    %13 = vector.broadcast %cst_4 : f32 to vector<16x32xf32>
    %14 = arith.select %12, %4, %13 : vector<16x32xi1>, vector<16x32xf32>
    %cst_5 = arith.constant dense<0.000000e+00> : vector<16xf32>
    %15 = vector.multi_reduction <add>, %14, %cst_5 [1] : vector<16x32xf32> to vector<16xf32>
    %16 = vector.shape_cast %15 : vector<16xf32> to vector<16x1xf32>
    %17 = arith.subf %8, %16 : vector<16x1xf32>
    %cst_6 = arith.constant 0.899999976 : f32
    %18 = vector.broadcast %cst_6 : f32 to vector<16x1xf32>
    %19 = arith.mulf %18, %17 : vector<16x1xf32>
    %cst_7 = arith.constant dense<0.000000e+00> : vector<16xf32>
    %20 = vector.multi_reduction <add>, %4, %cst_7 [1] : vector<16x32xf32> to vector<16xf32>
    %21 = vector.shape_cast %20 : vector<16xf32> to vector<16x1xf32>
    %cst_8 = arith.constant 3.200000e+01 : f32
    %22 = vector.broadcast %cst_8 : f32 to vector<16x1xf32>
    %23 = arith.mulf %22, %8 : vector<16x1xf32>
    %24 = arith.subf %23, %21 : vector<16x1xf32>
    %cst_9 = arith.constant 3.125000e-03 : f32
    %25 = vector.broadcast %cst_9 : f32 to vector<16x1xf32>
    %26 = arith.mulf %25, %24 : vector<16x1xf32>
    %27 = arith.addf %19, %26 : vector<16x1xf32>
    %c16_i32 = arith.constant 16 : i32
    %28 = arith.muli %arg0, %c16_i32 : i32
    %29 = tpu.iota {dimensions = array<i32: 0>} : vector<16x1xi32>
    %30 = vector.broadcast %28 : i32 to vector<16x1xi32>
    %31 = arith.addi %30, %29 : vector<16x1xi32>
    %c16_i32_10 = arith.constant 16 : i32
    %32 = vector.broadcast %c16_i32_10 : i32 to vector<16x1xi32>
    %33 = arith.cmpi slt, %31, %32 : vector<16x1xi32>
    %cst_11 = arith.constant 0.000000e+00 : f32
    %34 = vector.broadcast %cst_11 : f32 to vector<16x1xf32>
    %35 = arith.select %33, %27, %34 : vector<16x1xi1>, vector<16x1xf32>
    %c0_12 = arith.constant 0 : index
    %c0_13 = arith.constant 0 : index
    %36 = vector.load %arg3[%c0_12, %c0_13] : memref<16x1xf32, #tpu.memory_space<vmem>>, vector<16x1xf32>
    tpu.vector_store %arg3[%c0_12, %c0_13], %35 {strides = array<i32>} : memref<16x1xf32, #tpu.memory_space<vmem>>, vector<16x1xf32>,
    return
  }
  func.func @transform_0(%arg0: i32) -> (i32, i32) {
    %c0_i32 = arith.constant 0 : i32
    %c0_i32_0 = arith.constant 0 : i32
    return %arg0, %c0_i32 : i32, i32
  }
  func.func @transform_1(%arg0: i32) -> (i32, i32) {
    %c0_i32 = arith.constant 0 : i32
    %c0_i32_0 = arith.constant 0 : i32
    return %arg0, %c0_i32 : i32, i32
  }
  func.func @transform_2(%arg0: i32) -> (i32, i32) {
    %c0_i32 = arith.constant 0 : i32
    %c0_i32_0 = arith.constant 0 : i32
    return %arg0, %c0_i32 : i32, i32
  }
}

</mosaic_0001>

<bundles_post_ra>
// kernel: tpu_custom_call.1
= control target key start
LH: loop header
LB: loop body
LE: loop exit
PB: predicated region body
PF: predicated region fallthrough
CT: control target
= control target key end

     0   :  { %vm13_vm0 = vcmask 261120   ;;  %v103_v1 = vmov 0   ;;  %v38_v7 = vlaneseq  ;;  %vm85_vm3 = vcmask 7168   ;;  %s145_s0 = inlined_call_operand.vmem [shape: f32[16,32], index: 0, kind: input, shape index: {}]   ;;  %s146_s1 = inlined_call_operand.vmem [shape: s32[16,1], index: 1, kind: input, shape index: {}]   ;;  %s147_s2 = inlined_call_operand.vmem [shape: f32[16,1], index: 2, kind: output, shape index: {}]  }
   0x1   :  { %v11_v0 = vld [vmem:[%s145_s0] sm:$0xff]  ;;  %93 = vset.pattern.permute.xlu1 %v103_v1  ;;  %94 = vset.pattern.permute.xlu0 %v103_v1  ;;  %v12_v4 = vld [vmem:[%s145_s0 + $0x8] sm:$0xff] }
   0x2   :  { %v36_v2 = vld [vmem:[%s146_s1] sm:$0xff]  ;;  %v14_v3 = vsel %vm13_vm0, %v11_v0, -inf  ;;  %v37_v5 = vld [vmem:[%s146_s1 + $0x8] sm:$0xff]  ;;  %v17_v6 = vsel %vm13_vm0, %v12_v4, -inf  ;;  %v39_v8 = vand.u32 127, %v38_v7 }
   0x3   :  { %41 = vperm.xlu1 %93, %v36_v2   ;;  %15 = vmax.xlane.f32.xlu0 %v14_v3 }
   0xb   :  { %44 = vperm.xlu1 %93, %v37_v5   ;;  %18 = vmax.xlane.f32.xlu0 %v17_v6 }
  0x75   :  { %v42_v9 = vpop.permute.xlu1 %41 }
  0x76   :  { %v16_v10 = vpop.xlane.xlu0 %15  ;;  %vm46_vm1 = vcmp.eq.s32.totalorder %v39_v8, %v42_v9 }
  0x77   :  { %v20_v11 = vsub.f32 %v11_v0, %v16_v10 }
  0x79   :  { %v22_v12 = vmul.f32 1.442695, %v20_v11  ;;  %v48_v13 = vsel %vm46_vm1, %v20_v11, 0.0  ;;  %v60_v26 = vsel %vm13_vm0, %v20_v11, 0.0 }
  0x7a   :  { %v50_v14 = vsel %vm13_vm0, %v48_v13, 0.0 }
  0x7b   :  { %95 = vpow2.f32 %v22_v12  ;;  %51 = vadd.xlane.f32.xlu0 %v50_v14 }
  0x7d   :  { %v45_v15 = vpop.permute.xlu1 %44 }
  0x7e   :  { %v19_v16 = vpop.xlane.xlu0 %18  ;;  %vm47_vm2 = vcmp.eq.s32.totalorder %v39_v8, %v45_v15 }
  0x7f   :  { %v21_v17 = vsub.f32 %v12_v4, %v19_v16 }
  0x81   :  { %v96_v18 = vpop.eup %95  ;;  %v24_v19 = vmul.f32 1.442695, %v21_v17  ;;  %v63_v20 = vsel %vm13_vm0, %v21_v17, 0.0  ;;  %v49_v21 = vsel %vm47_vm2, %v21_v17, 0.0 }
  0x82   :  { %v26_v22 = vsel %vm13_vm0, %v96_v18, 0.0  ;;  %v53_v23 = vsel %vm13_vm0, %v49_v21, 0.0 }
  0x83   :  { %97 = vpow2.f32 %v24_v19  ;;  %27 = vadd.xlane.f32.xlu2 %v26_v22  ;;  %64 = vadd.xlane.f32.xlu0 %v63_v20 }
  0x84   :  { %54 = vadd.xlane.f32.xlu1 %v53_v23 }
  0x89   :  { %v98_v24 = vpop.eup %97 }
  0x8a   :  { %v29_v25 = vsel %vm13_vm0, %v98_v24, 0.0 }
  0x8b   :  { %30 = vadd.xlane.f32.xlu2 %v29_v25 }
  0x93   :  { %61 = vadd.xlane.f32.xlu2 %v60_v26 }
  0xee   :  { %v52_v30 = vpop.xlane.xlu0 %51 }
  0xf6   :  { %v28_v27 = vpop.xlane.xlu2 %27  ;;  %v65_v42 = vpop.xlane.xlu0 %64 }
  0xf7   :  { %99 = vlog2.f32 %v28_v27  ;;  %v55_v37 = vpop.xlane.xlu1 %54 }
  0xfd   :  { %v100_v28 = vpop.eup %99 }
  0xfe   :  { %v31_v29 = vpop.xlane.xlu2 %30  ;;  %v33_v31 = vmul.f32 0.6931472, %v100_v28 }
  0xff   :  { %101 = vlog2.f32 %v31_v29 }
 0x100   :  { %v56_v33 = vsub.f32 %v33_v31, %v52_v30  ;;  %v66_v34 = vmul.f32 32.0, %v33_v31 }
 0x102   :  { %v58_v41 = vmul.f32 0.9, %v56_v33 }
 0x105   :  { %v102_v32 = vpop.eup %101 }
 0x106   :  { %v35_v35 = vmul.f32 0.6931472, %v102_v32  ;;  %v62_v36 = vpop.xlane.xlu2 %61 }
 0x107   :  { %v68_v38 = vsub.f32 %v66_v34, %v62_v36 }
 0x108   :  { %v57_v39 = vsub.f32 %v35_v35, %v55_v37  ;;  %v67_v40 = vmul.f32 32.0, %v35_v35 }
 0x109   :  { %v70_v43 = vmul.f32 0.003125, %v68_v38 }
 0x10a   :  { %v69_v44 = vsub.f32 %v67_v40, %v65_v42  ;;  %v59_v46 = vmul.f32 0.9, %v57_v39 }
 0x10b   :  { %v72_v45 = vadd.f32 %v70_v43, %v58_v41 }
 0x10c   :  { %v71_v47 = vmul.f32 0.003125, %v69_v44 }
 0x10d   :  { %86 = vst.msk [vmem:[%s147_s2] sm:$0xff] %vm85_vm3, %v72_v45 }
 0x10e   :  { %v73_v48 = vadd.f32 %v71_v47, %v59_v46 }
 0x110   :  { %87 = vst.msk [vmem:[%s147_s2 + $0x8] sm:$0xff] %vm85_vm3, %v73_v48 }

</bundles_post_ra>
